<compile_context>
chip_gen: v6e
topology: v6e:2x2x1
jax: 0.10.0
libtpu: 0.0.40
codegen_flags: <defaults>
</compile_context>

<pallas_src>
import jax
import jax.numpy as jnp
from jax import lax
from jax.experimental import pallas as pl
from jax.experimental.pallas import tpu as pltpu

_LANE = 128
_SUBLANE = 8


def _make_kernel(C, TC):
    needs_c_mask = (C % TC) != 0

    def kernel(x1_ref, x2_ref, o_ref, acc_ref):
        c = pl.program_id(2)

        @pl.when(c == 0)
        def _init():
            acc_ref[...] = jnp.zeros_like(acc_ref)

        # Subtract in input dtype; square + channel-sum accumulate in f32.
        # (abs() is redundant before squaring.)
        d = (x1_ref[...] - x2_ref[...]).astype(jnp.float32)
        if needs_c_mask:
            # Ragged last C block: zero the contribution of padded channels.
            ch = c * TC + lax.broadcasted_iota(jnp.int32, (1, TC, d.shape[-1]), 1)
            d = jnp.where(ch < C, d, 0.0)
        acc_ref[...] += jnp.sum(d * d, axis=1)

        @pl.when(c == pl.num_programs(2) - 1)
        def _store():
            o_ref[...] = acc_ref[...].astype(o_ref.dtype)

    return kernel


def _vmem_capacity_bytes():
    try:
        info = pltpu.get_tpu_info()
        cap = getattr(info, "vmem_capacity_bytes", None)
        if cap:
            return int(cap)
    except Exception:
        pass
    return 64 << 20  # conservative (v7x-sized) default


def _pick_tiles(N, C, HW, max_block_elems):
    """Pick (TN, TC, THW) so one input block holds <= max_block_elems elements,
    output stores stay sublane/lane dense, and the (8,128) BlockSpec rules hold
    (TC / THW / output-TN are multiples of 8/128 or equal the full dim)."""
    min_thw = HW if HW < _LANE else _LANE

    TN = N if N < _SUBLANE else _SUBLANE

    # Channel tile: full C when it fits at the minimum spatial tile, else the
    # largest multiple of 8 that fits (ragged last block masked in-kernel).
    TC = C
    if TN * TC * min_thw > max_block_elems:
        TC = (max_block_elems // (TN * min_thw)) // _SUBLANE * _SUBLANE
        TC = max(_SUBLANE, min(TC, C))

    # Spatial tile: as many 128-lane units as the budget allows (cdiv grid;
    # the ragged last block is handled by masked output stores).
    if HW <= _LANE:
        THW = HW
    else:
        full_units = pl.cdiv(HW, _LANE)
        units = max(1, min(full_units, max_block_elems // (TN * TC * _LANE)))
        THW = units * _LANE

    # If the spatial tile already covers HW, grow TN with the leftover budget.
    if THW >= HW and N > TN:
        max_tn = max_block_elems // (TC * THW)
        if max_tn >= N:
            TN = N
        elif max_tn >= 2 * _SUBLANE:
            TN = (max_tn // _SUBLANE) * _SUBLANE

    # Give megacore / v7x's two TensorCores at least two parallel blocks.
    if pl.cdiv(N, TN) * pl.cdiv(HW, THW) == 1:
        if HW > _LANE:
            THW = pl.cdiv(pl.cdiv(HW, _LANE), 2) * _LANE
        elif N >= 2 * _SUBLANE:
            TN = pl.cdiv(pl.cdiv(N, 2), _SUBLANE) * _SUBLANE

    return TN, TC, THW


def normal_distance(x1, x2, eps=1e-06, *, max_block_elems=None):
    # eps is accepted for signature parity with the PyTorch module but is
    # unused in its forward pass (intentional).
    del eps
    assert x1.shape == x2.shape
    N, C, H, W = x1.shape
    HW = H * W

    x1f = x1.reshape(N, C, HW)  # free reshapes, no HBM copies
    x2f = x2.reshape(N, C, HW)

    itemsize = jnp.dtype(x1.dtype).itemsize
    vmem_cap = _vmem_capacity_bytes()
    if max_block_elems is None:
        # ~8 MiB f32 input blocks on 128 MiB-VMEM parts (v5e/v6e), ~4 MiB on
        # 64 MiB parts (v7x); expressed in elements so bf16/fp8 stay safe too.
        max_block_elems = (2 << 20) if vmem_cap >= (96 << 20) else (1 << 20)

    TN, TC, THW = _pick_tiles(N, C, HW, max_block_elems)

    in_block_bytes = TN * TC * THW * itemsize
    out_block_bytes = TN * THW * itemsize
    acc_bytes = TN * THW * 4
    temp_bytes = 2 * TN * TC * THW * 4  # headroom for in-kernel f32 temporaries
    need = 4 * in_block_bytes + 2 * out_block_bytes + acc_bytes + temp_bytes + (8 << 20)
    cap = (96 << 20) if vmem_cap >= (96 << 20) else (48 << 20)
    vmem_limit = int(max(32 << 20, min(need, cap)))

    grid = (pl.cdiv(N, TN), pl.cdiv(HW, THW), pl.cdiv(C, TC))

    out = pl.pallas_call(
        _make_kernel(C, TC),
        out_shape=jax.ShapeDtypeStruct((N, HW), x1.dtype),
        grid_spec=pltpu.PrefetchScalarGridSpec(
            num_scalar_prefetch=0,
            grid=grid,
            in_specs=[
                pl.BlockSpec((TN, TC, THW), lambda n, h, c: (n, c, h)),
                pl.BlockSpec((TN, TC, THW), lambda n, h, c: (n, c, h)),
            ],
            out_specs=pl.BlockSpec((TN, THW), lambda n, h, c: (n, h)),
            scratch_shapes=[pltpu.VMEM((TN, THW), jnp.float32)],
        ),
        compiler_params=pltpu.CompilerParams(
            dimension_semantics=("parallel", "parallel", "arbitrary"),
            vmem_limit_bytes=vmem_limit,
        ),
    )(x1f, x2f)

    return out.reshape(N, 1, H, W)


def _reference(x1, x2):
    return jnp.sum(jnp.abs(x1 - x2) ** 2, axis=1, keepdims=True)


if __name__ == "__main__":
    key = jax.random.PRNGKey(0)

    # Main demo shape.
    k1, k2 = jax.random.split(key)
    N, C, H, W = 2, 4, 16, 16
    x1 = jax.random.normal(k1, (N, C, H, W), dtype=jnp.float32)
    x2 = jax.random.normal(k2, (N, C, H, W), dtype=jnp.float32)
    out = normal_distance(x1, x2)
    jax.block_until_ready(out)
    assert out.shape == (N, 1, H, W)
    assert jnp.allclose(out, _reference(x1, x2), atol=1e-5, rtol=1e-5)

    # Ragged HW (> 128, not a multiple of 128): exercises masked edge stores
    # without any wrapper-side padding.
    k3, k4 = jax.random.split(k1)
    y1 = jax.random.normal(k3, (2, 4, 10, 13), dtype=jnp.float32)
    y2 = jax.random.normal(k4, (2, 4, 10, 13), dtype=jnp.float32)
    out2 = normal_distance(y1, y2)
    jax.block_until_ready(out2)
    assert out2.shape == (2, 1, 10, 13)
    assert jnp.allclose(out2, _reference(y1, y2), atol=1e-5, rtol=1e-5)

    # Force C tiling + ragged-C masking via a tiny block budget (test knob).
    k5, k6 = jax.random.split(k2)
    z1 = jax.random.normal(k5, (2, 20, 8, 8), dtype=jnp.float32)
    z2 = jax.random.normal(k6, (2, 20, 8, 8), dtype=jnp.float32)
    out3 = normal_distance(z1, z2, max_block_elems=2048)
    jax.block_until_ready(out3)
    assert out3.shape == (2, 1, 8, 8)
    assert jnp.allclose(out3, _reference(z1, z2), atol=1e-5, rtol=1e-5)

    print("KERNEL_OK")
</pallas_src>

<mosaic_0001>
module attributes {stable_mosaic.version = 11 : i64} {
  func.func @kernel(%arg0: i32, %arg1: i32, %arg2: i32, %arg3: memref<2x4x128xf32, #tpu.memory_space<vmem>>, %arg4: memref<2x4x128xf32, #tpu.memory_space<vmem>>, %arg5: memref<2x128xf32, #tpu.memory_space<vmem>>, %arg6: memref<2x128xf32, #tpu.memory_space<vmem>>) attributes {dimension_semantics = [#tpu.dimension_semantics<parallel>, #tpu.dimension_semantics<parallel>, #tpu.dimension_semantics<arbitrary>], iteration_bounds = array<i64: 1, 2, 1>, scalar_prefetch = 0 : i64, scratch_operands = 1 : i64, tpu.core_type = #tpu.core_type<tc>, window_params = [{transform_indices = @transform_0, window_bounds = array<i64: 2, 4, 128>}, {transform_indices = @transform_1, window_bounds = array<i64: 2, 4, 128>}, {transform_indices = @transform_2, window_bounds = array<i64: 2, 128>}]} {
    %c0_i32 = arith.constant 0 : i32
    %0 = arith.cmpi eq, %arg2, %c0_i32 : i32
    %1 = arith.extui %0 : i1 to i32
    %c0_i32_0 = arith.constant 0 : i32
    %2 = arith.cmpi ne, %1, %c0_i32_0 : i32
    scf.if %2 {
      %cst_12 = arith.constant 0.000000e+00 : f32
      %14 = vector.broadcast %cst_12 : f32 to vector<2x128xf32>
      %c0_13 = arith.constant 0 : index
      %c0_14 = arith.constant 0 : index
      %15 = vector.load %arg6[%c0_13, %c0_14] : memref<2x128xf32, #tpu.memory_space<vmem>>, vector<2x128xf32>
      tpu.vector_store %arg6[%c0_13, %c0_14], %14 {strides = array<i32>} : memref<2x128xf32, #tpu.memory_space<vmem>>, vector<2x128xf32>,
    } else {
    }
    %c0 = arith.constant 0 : index
    %c0_1 = arith.constant 0 : index
    %c0_2 = arith.constant 0 : index
    %3 = vector.load %arg3[%c0, %c0_1, %c0_2] : memref<2x4x128xf32, #tpu.memory_space<vmem>>, vector<2x4x128xf32>
    %c0_3 = arith.constant 0 : index
    %c0_4 = arith.constant 0 : index
    %c0_5 = arith.constant 0 : index
    %4 = vector.load %arg4[%c0_3, %c0_4, %c0_5] : memref<2x4x128xf32, #tpu.memory_space<vmem>>, vector<2x4x128xf32>
    %5 = arith.subf %3, %4 : vector<2x4x128xf32>
    %c0_6 = arith.constant 0 : index
    %c0_7 = arith.constant 0 : index
    %6 = vector.load %arg6[%c0_6, %c0_7] : memref<2x128xf32, #tpu.memory_space<vmem>>, vector<2x128xf32>
    %7 = arith.mulf %5, %5 : vector<2x4x128xf32>
    %cst = arith.constant dense<0.000000e+00> : vector<2x128xf32>
    %8 = vector.multi_reduction <add>, %7, %cst [1] : vector<2x4x128xf32> to vector<2x128xf32>
    %9 = arith.addf %6, %8 : vector<2x128xf32>
    %c0_8 = arith.constant 0 : index
    %c0_9 = arith.constant 0 : index
    %10 = vector.load %arg6[%c0_8, %c0_9] : memref<2x128xf32, #tpu.memory_space<vmem>>, vector<2x128xf32>
    tpu.vector_store %arg6[%c0_8, %c0_9], %9 {strides = array<i32>} : memref<2x128xf32, #tpu.memory_space<vmem>>, vector<2x128xf32>,
    %c0_i32_10 = arith.constant 0 : i32
    %11 = arith.cmpi eq, %arg2, %c0_i32_10 : i32
    %12 = arith.extui %11 : i1 to i32
    %c0_i32_11 = arith.constant 0 : i32
    %13 = arith.cmpi ne, %12, %c0_i32_11 : i32
    scf.if %13 {
      %c0_12 = arith.constant 0 : index
      %c0_13 = arith.constant 0 : index
      %14 = vector.load %arg6[%c0_12, %c0_13] : memref<2x128xf32, #tpu.memory_space<vmem>>, vector<2x128xf32>
      %c0_14 = arith.constant 0 : index
      %c0_15 = arith.constant 0 : index
      %15 = vector.load %arg5[%c0_14, %c0_15] : memref<2x128xf32, #tpu.memory_space<vmem>>, vector<2x128xf32>
      tpu.vector_store %arg5[%c0_14, %c0_15], %14 {strides = array<i32>} : memref<2x128xf32, #tpu.memory_space<vmem>>, vector<2x128xf32>,
    } else {
    }
    return
  }
  func.func @transform_0(%arg0: i32, %arg1: i32, %arg2: i32) -> (i32, i32, i32) {
    %c0_i32 = arith.constant 0 : i32
    return %arg0, %arg2, %arg1 : i32, i32, i32
  }
  func.func @transform_1(%arg0: i32, %arg1: i32, %arg2: i32) -> (i32, i32, i32) {
    %c0_i32 = arith.constant 0 : i32
    return %arg0, %arg2, %arg1 : i32, i32, i32
  }
  func.func @transform_2(%arg0: i32, %arg1: i32, %arg2: i32) -> (i32, i32) {
    %c0_i32 = arith.constant 0 : i32
    return %arg0, %arg1 : i32, i32
  }
}

</mosaic_0001>

<bundles_post_ra>
// kernel: tpu_custom_call.1
= control target key start
LH: loop header
LB: loop body
LE: loop exit
PB: predicated region body
PF: predicated region fallthrough
CT: control target
= control target key end

     0   :  { %s837_s0 = inlined_call_operand.hbm [shape: f32[2,4,256], index: 0, kind: input, shape index: {}]   ;;  %s838_s1 = inlined_call_operand.hbm [shape: f32[2,4,256], index: 1, kind: input, shape index: {}]   ;;  %s839_s2 = inlined_call_operand.hbm [shape: f32[2,256], index: 2, kind: output, shape index: {}]  }
   0x1   :  { %840 = sst [smem:[#allocation12_spill]] %s837_s0 }
   0x2   :  { %7 = vsyncpa [#allocation4], 0 }
   0x3   :  { %9 = vsyncpa [#allocation4 + $0x1], 0 }
   0x4   :  { %10 = vsyncpa [#allocation7], 0 }
   0x5   :  { %12 = vsyncpa [#allocation7 + $0x1], 0 }
   0x6   :  { %13 = vsyncpa [#allocation5], 0 }
   0x7   :  { %15 = vsyncpa [#allocation5 + $0x1], 0  ;;  %s663_s9 = smov 0   ;;  %s665_s10 = smov 0  }
   0x8   :  { %s667_s11 = smov 0   ;;  %s669_s12 = smov 0  }
   0x9   :  { %s671_s13 = smov 0   ;;  %s673_s14 = smov 0  }
   0xa LB: > { %s412_s15 = sadd.s32 4294967295, %s639_s14   ;;  %s413_s16 = sadd.s32 4294967294, %s639_s14   ;;  %s639_s14 = sphi %s673_s14, %s21_s14   ;;  %s635_s13 = sphi %s671_s13, %s853_s13   ;;  %s631_s12 = sphi %s669_s12, %s852_s12   ;;  %s627_s11 = sphi %s667_s11, %s851_s11   ;;  %s623_s10 = sphi %s665_s10, %s850_s10   ;;  %s619_s9 = sphi %s663_s9, %s849_s9  }
   0xb   : > { %s36_s17 = sadd.s32 1, %s635_s13  ;;  %s51_s18 = sadd.s32 1, %s627_s11 }
   0xc   : > { %p38_p0 = scmp.ge.s32.totalorder %s36_s17, 2  ;;  %p58_p1 = scmp.ne.s32.totalorder %s627_s11, %s623_s10 }
   0xd   : > { %p59_p2 = scmp.eq.s32.totalorder %s639_s14, 0  ;;  %p64_p3 = scmp.ne.s32.totalorder %s623_s10, %s619_s9 }
   0xe   : > { %s855_s17 = smov (%p38_p0, %s36_s17), 0  ;;  %p65_p5 = scmp.eq.s32.totalorder %s412_s15, 0 }
   0xf   : > { %p704_p4 = por %p59_p2, %p58_p1  ;;  %s47_s20 = ssub.s32 %s635_s13, %s855_s17 }
  0x10   : > { %p120_p6 = scmp.eq.s32.totalorder %s412_s15, 1  ;;  %p49_p7 = scmp.eq.s32.totalorder %s47_s20, 0 }
  0x11   : > { %p710_p8 = por %p65_p5, %p64_p3  ;;  %p126_p10 = scmp.eq.s32.totalorder %s413_s16, 1 }
  0x12   : > { %p714_p9 = por %p120_p6, %p58_p1  ;;  %p445_p13 = scmp.lt.s32.totalorder %s639_s14, 2 }
  0x13   : > { %s719_s23 = scalar_select %p49_p7, %s627_s11, %s51_s18  }
  0x14   : > { %p721_p11 = por %p126_p10, %p64_p3  ;;  %s728_s25 = sand.u32 1, %s627_s11  }
  0x15   : > { %s416_s26 = sshll.u32 %s728_s25, 3  ;;  %s417_s27 = sshll.u32 %s635_s13, 6 }
  0x16   : > { %s845_s0 = sld [smem:[#allocation12_spill]]  ;;  %s150_s3 = scalar_lea.vmem [#allocation3], %s416_s26 }
  0x17   : > { %s161_s4 = sshll.u32 %s150_s3, 4  ;;  %p741_p0 = pnand %p445_p13, %p704_p4  ;;  %s162_s4 = int_to_ptr.vmem [resolvable:$true] %s161_s4 }
  0x18   : > { %s147_s6 = scalar_lea.sflag [#allocation4], %s728_s25  ;;  %s512_s7 = scalar_lea.vmem %s162_s4, 128 }
  0x19   : > { %p501_p1 = pneg %p741_p0  ;;  %p513_p2 = scmp.ne.s32.totalorder %s162_s4, %s512_s7 }
  0x1a   : > { %s641_s8 = smov [#allocation3]  }
  0x1b   : > { %p515_p3 = pnand %p513_p2, %p501_p1  ;;  %s517_s15 = sshll.u32 %s641_s8, 4  ;;  %s518_s15 = int_to_ptr.vmem [resolvable:$false] %s517_s15 }
  0x1c   : > { %s160_s30 = scalar_lea.hbm %s845_s0, %s417_s27  ;;  %s519_s16 = scalar_lea.vmem %s518_s15, 256 }
  0x1d   : > { %p516_p5 = pneg %p515_p3  ;;  %p520_p6 = scmp.lt.s32.totalorder %s162_s4, %s518_s15 }
  0x1e   : > { %p521_p4 = scmp.lt.s32.totalorder %s519_s16, %s512_s7 }
  0x20   : > { %p522_p7 = por %p521_p4, %p520_p6 }
  0x22   : > { %p523_p10 = pnand %p522_p7, %p516_p5 }
  0x24   : > { %526 = shalt.err (!%p523_p10)
}
  0x25   : > { %s642_s18 = smov 128   ;;  %s643_s19 = smov 64  }
  0x26   : > { %s644_s20 = smov 4   ;;  %p420_p13 = scmp.ge.s32.totalorder %s639_s14, 1 }
  0x27   : > { %437 = dma.hbm_to_vmem [thread:$0]  (!%p741_p0), %s160_s30, 128, %s162_s4, %s147_s6, %s642_s18, %s643_s19, %s644_s20  }
  0x28   : > { %p194_p2 = scmp.lt.s32.totalorder %s639_s14, 3  ;;  %s185_s7 = scalar_lea.hbm %s838_s1, %s417_s27 }
  0x29   : > { %s175_s8 = scalar_lea.vmem [#allocation6], %s416_s26  ;;  %s172_s16 = scalar_lea.sflag [#allocation7], %s728_s25 }
  0x2a   : > { %p756_p3 = pnand %p420_p13, %p194_p2  ;;  %s186_s15 = sshll.u32 %s175_s8, 4  ;;  %s187_s15 = int_to_ptr.vmem [resolvable:$true] %s186_s15 }
  0x2b   : > { %s540_s0 = scalar_lea.vmem %s187_s15, 128  ;;  %s645_s30 = smov [#allocation6]  }
  0x2c   : > { %p541_p5 = scmp.ne.s32.totalorder %s187_s15, %s540_s0  ;;  %s545_s4 = sshll.u32 %s645_s30, 4  ;;  %s546_s4 = int_to_ptr.vmem [resolvable:$false] %s545_s4 }
  0x2d   : > { %s547_s6 = scalar_lea.vmem %s546_s4, 256  ;;  %p548_p7 = scmp.lt.s32.totalorder %s187_s15, %s546_s4 }
  0x2e   : > { %p543_p6 = pnand %p541_p5, %p501_p1  ;;  %p549_p10 = scmp.lt.s32.totalorder %s547_s6, %s540_s0 }
  0x30   : > { %p544_p4 = pneg %p543_p6  ;;  %p550_p13 = por %p549_p10, %p548_p7 }
  0x32   : > { %p551_p2 = pnand %p550_p13, %p544_p4 }
  0x34   : > { %554 = shalt.err (!%p551_p2)
}
  0x35   : > { %440 = dma.hbm_to_vmem [thread:$0]  (!%p741_p0), %s185_s7, 128, %s187_s15, %s172_s16, %s642_s18, %s643_s19, %s644_s20  }
  0x36   : > { %198 = sbr.rel (%p756_p3) target bundleno = 105 (0x69), region = 28  ;;  %s777_s25 = sand.u32 (!%p756_p3), 1, %s623_s10  }
  0x37   : > { %s421_s26 = sshll.u32 (!%p756_p3), %s777_s25, 3  ;;  %s201_s27 = scalar_lea.sflag (!%p756_p3), [#allocation4], %s777_s25 }
  0x38   : > { %s204_s29 = scalar_lea.vmem (!%p756_p3), [#allocation3], %s421_s26 }
  0x3b   : > { %606 = dma.done.wait (%p710_p8), %s201_s27, 128  }
  0x3c   : > { %608 = vsyncadd (%p710_p8), %s201_s27, 4294967168  ;;  %s210_s0 = scalar_lea.sflag [#allocation7], %s777_s25  ;;  %s213_s5 = scalar_lea.vmem [#allocation6], %s421_s26 }
  0x3d   : > { %610 = dma.done.wait (%p710_p8), %s210_s0, 128  }
  0x3e   : > { %612 = vsyncadd (%p710_p8), %s210_s0, 4294967168  ;;  %v646_v0 = vmov 0.0   ;;  %v246_v1 = vld [vmem:[%s204_s29] sm:$0xf]  ;;  %v247_v2 = vld [vmem:[%s204_s29 + $0x4] sm:$0xf] }
  0x3f   : > { %245 = vst [vmem:[#allocation2] sm:$0x3] %v646_v0  ;;  %v248_v3 = vld [vmem:[%s213_s5] sm:$0xf]  ;;  %v249_v4 = vld [vmem:[%s213_s5 + $0x4] sm:$0xf] }
  0x40   : > { %v250_v5 = vsub.f32 %v246_v1, %v248_v3  ;;  %v251_v6 = vsub.f32 %v247_v2, %v249_v4  ;;  %vm255_vm0 = vcmask 1043456   ;;  %vm272_vm1 = vcmask 1041409   ;;  %s423_s21 = sshll.u32 %s777_s25, 1  ;;  %s425_s20 = sshll.u32 %s631_s12, 5 }
  0x41   : > { %s238_s18 = scalar_lea.vmem [#allocation8], %s423_s21  ;;  %s296_s7 = scalar_lea.hbm %s839_s2, %s425_s20 }
  0x42   : > { %v253_v7 = vmul.f32 %v250_v5, %v250_v5  ;;  %v254_v8 = vmul.f32 %v251_v6, %v251_v6  ;;  %s298_s19 = sshll.u32 %s238_s18, 4  ;;  %s283_s8 = scalar_lea.sflag [#allocation5], %s777_s25  ;;  %s792_s19 = int_to_ptr.vmem [resolvable:$true] %s298_s19 }
  0x43   : > { %s555_s15 = scalar_lea.vmem %s792_s19, 32  ;;  %s647_s16 = smov [#allocation8]  }
  0x44   : > { %v256_v9 = vsel %vm255_vm0, %v253_v7, 0.0  ;;  %v263_v11 = vsel %vm255_vm0, %v254_v8, 0.0  ;;  %p556_p8 = scmp.ne.s32.totalorder %s792_s19, %s555_s15  ;;  %s559_s30 = sshll.u32 %s647_s16, 4  ;;  %s560_s30 = int_to_ptr.vmem [resolvable:$false] %s559_s30 }
  0x45   : > { %v257_v10 = vrot.slane %v256_v9, 4  ;;  %v264_v12 = vrot.slane %v263_v11, 4  ;;  %s561_s12 = scalar_lea.vmem %s560_s30, 64  ;;  %p562_p3 = scmp.lt.s32.totalorder %s792_s19, %s560_s30 }
  0x46   : > { %v252_v22 = vld [vmem:[#allocation2] sm:$0x3]  ;;  %p557_p0 = pnand %p556_p8, %p714_p9  ;;  %p563_p5 = scmp.lt.s32.totalorder %s561_s12, %s555_s15 }
  0x47   : > { %v258_v13 = vadd.f32 %v257_v10, %v256_v9  ;;  %v265_v14 = vadd.f32 %v264_v12, %v263_v11 }
  0x48   : > { %p558_p1 = pneg %p557_p0  ;;  %p564_p6 = por %p563_p5, %p562_p3 }
  0x49   : > { %v259_v15 = vrot.slane %v258_v13, 2  ;;  %v266_v16 = vrot.slane %v265_v14, 2 }
  0x4a   : > { %p565_p4 = pnand %p564_p6, %p558_p1 }
  0x4b   : > { %v260_v17 = vadd.f32 %v259_v15, %v258_v13  ;;  %v267_v18 = vadd.f32 %v266_v16, %v265_v14 }
  0x4d   : > { %v261_v19 = vrot.slane %v260_v17, 1  ;;  %v268_v20 = vrot.slane %v267_v18, 1 }
  0x4f   : > { %v262_v21 = vadd.f32 %v261_v19, %v260_v17  ;;  %v269_v23 = vadd.f32 %v268_v20, %v267_v18 }
  0x51   : > { %v273_v24 = vsel %vm272_vm1, %v269_v23, %v262_v21 }
  0x52   : > { %v275_v25 = vadd.f32 %v273_v24, %v252_v22 }
  0x54   : > { %276 = vst [vmem:[#allocation2] sm:$0x3] %v275_v25 }
  0x5b   : > { %v280_v26 = vld [vmem:[#allocation2] sm:$0x3] }
  0x5c   : > { %281 = vst [vmem:[%s238_s18] sm:$0x3] %v280_v26 }
  0x5d   : > { %568 = shalt.err (!%p565_p4)
}
  0x5e   : > { %s569_s4 = scalar_lea.hbm %s296_s7, 32  ;;  %s573_s26 = scalar_lea.hbm %s839_s2, 64 }
  0x5f   : > { %p570_p7 = scmp.ne.s32.totalorder %s296_s7, %s569_s4  ;;  %p574_p2 = scmp.lt.s32.totalorder %s296_s7, %s839_s2 }
  0x60   : > { %p575_p8 = scmp.lt.s32.totalorder %s573_s26, %s569_s4 }
  0x61   : > { %p571_p10 = pnand %p570_p7, %p714_p9 }
  0x62   : > { %p576_p0 = por %p575_p8, %p574_p2 }
  0x63   : > { %p572_p13 = pneg %p571_p10 }
  0x65   : > { %p577_p12 = pnand %p576_p0, %p572_p13 }
  0x67   : > { %580 = shalt.err (!%p577_p12)
}
  0x68   : > { %432 = dma.vmem_to_hbm [thread:$0]  (%p714_p9), %s792_s19, 32, %s296_s7, %s283_s8  }
  0x69 PF: > { %s310_s0 = sand.u32 1, %s619_s9   ;;  %p848_p1 = scmp.ge.s32.totalorder %s639_s14, 2 }
  0x6a   : > { %s311_s5 = scalar_lea.sflag [#allocation5], %s310_s0 }
  0x6b   : > { %p442_p3 = pnand %p848_p1, %p721_p11 }
  0x6d   : > { %p443_p5 = pneg %p442_p3 }
  0x6f   : > { %614 = dma.done.wait (%p443_p5), %s311_s5, 32  }
  0x70   : > { %616 = vsyncadd (%p443_p5), %s311_s5, 4294967264  ;;  %s21_s14 = sadd.s32 1, %s639_s14   ;;  %s849_s9 = smov %s623_s10 }
  0x71   : > { %p18_p6 = scmp.ge.s32.totalorder %s21_s14, 4   ;;  %s850_s10 = smov %s627_s11 }
  0x72   : > { %s851_s11 = smov %s719_s23  ;;  %s852_s12 = smov %s635_s13 }
  0x73   : > { %s853_s13 = smov %s855_s17  ;;  %20 = sbr.rel (!%p18_p6) target bundleno = 10 (0xa), region = 94 }
  0x78   :  { %316 = vsyncpa [#allocation4], 1 }
  0x79   :  { %318 = vsyncpa [#allocation4 + $0x1], 1 }
  0x7a   :  { %319 = vsyncpa [#allocation7], 1 }
  0x7b   :  { %321 = vsyncpa [#allocation7 + $0x1], 1 }
  0x7c   :  { %322 = vsyncpa [#allocation5], 1 }
  0x7d   :  { %324 = vsyncpa [#allocation5 + $0x1], 1 }

</bundles_post_ra>
